<compile_context>
chip_gen: v7x
topology: tpu7x:2x2x1
jax: 0.10.0
libtpu: 0.0.40
codegen_flags: <defaults>
</compile_context>

<pallas_src>
import functools

import jax
import jax.numpy as jnp
import numpy as np
from jax.experimental import pallas as pl
from jax.experimental.pallas import tpu as pltpu


def gcn_kernel(x_ref, w_ref, brow_ref, bcol_ref, ak_ref, o_ref, *, a_first):
    # x_ref    : (NB*Cin,  L)        current (batch-block, t-block) slab (compute dtype)
    # w_ref    : (NB*Cout, NB*Cin)   kron(I_NB, W), f32, resident
    # brow_ref : (NB*Cout, 1)        bias row factor, f32, resident
    # bcol_ref : (1, L)              tile(colsum(A), TB) column factor, f32, resident
    # ak_ref   : (L, L)              kron(I_TB, A) (compute dtype), resident
    # o_ref    : (NB*Cout, L)
    x = x_ref[...]
    w = w_ref[...]
    ak = ak_ref[...]

    if a_first:
        # Graph contraction first (Cin <= Cout): fewer rows through the big matmul.
        t = jnp.dot(x, ak, preferred_element_type=jnp.float32)        # (NB*Cin, L) f32
        # Channel matmul in f32 (small K = NB*Cin): no bf16 downcast of t.
        y = jnp.dot(w, t, preferred_element_type=jnp.float32)         # (NB*Cout, L) f32
    else:
        # 1x1 conv first (Cout < Cin): small-K matmul, then the big A-contraction.
        t = jnp.dot(w, x, preferred_element_type=jnp.float32)         # (NB*Cout, L) f32
        y = jnp.dot(t.astype(x.dtype), ak, preferred_element_type=jnp.float32)

    # Exact bias refactor: (W x + b 1) @ kron(I, A) == W x kron(I, A) + b (x) tile(colsum A).
    y = y + brow_ref[...] * bcol_ref[...]                              # rank-1, f32
    o_ref[...] = y.astype(o_ref.dtype)


def _mxu_depth():
    """One MXU contraction pass: 128 on v5e (and older), 256 on v6e / v7x."""
    try:
        kind = jax.devices()[0].device_kind.lower()
    except Exception:
        return 256
    return 256 if ("v6" in kind or "v7" in kind or "7x" in kind) else 128


def _divisors_desc(n):
    return [d for d in range(n, 0, -1) if n % d == 0]


def _pick_t_tiling(T, V, l_cap):
    """Pick (TB, Vp): TB | T, L = TB*Vp a multiple of 128 and <= l_cap,
    minimal V padding first, then the largest L (biggest lane-dense slab)."""
    for Vp in range(V, V + 128):
        for TB in _divisors_desc(T):
            L = TB * Vp
            if L <= l_cap and L % 128 == 0:
                return TB, Vp
    # V alone exceeds one MXU pass: one time-step per block, lane-pad V to 128.
    return 1, ((V + 127) // 128) * 128


def _pick_nb(N, Cin, Cout, n_tblocks):
    """Batch elements per grid step: fill the matmul M/sublane dims
    (NB*Cin ~ 8..128) while keeping block row dims 8-aligned (or full) and,
    when possible, >= 2 grid steps so both v7x TensorCores get work."""
    divs = [d for d in range(1, N + 1) if N % d == 0]
    cands = [nb for nb in divs
             if nb * Cin <= 128 and nb * Cout <= 512
             and (nb * Cin % 8 == 0 or nb == N)
             and (nb * Cout % 8 == 0 or nb == N)]
    if not cands:
        # Corner fallback: keep the block shapes legal above all else.
        cands = [nb for nb in divs
                 if nb * Cin % 8 == 0 and nb * Cout % 8 == 0] or [N]
        return min(cands)
    pref = [nb for nb in cands if (N // nb) * n_tblocks >= 2]
    return max(pref) if pref else max(cands)


def gcn_forward(x_nchw, A, weight, bias, *, compute_dtype=jnp.bfloat16, out_dtype=None):
    """x_nchw: (N, Cin, T, V), A: (V, V), weight: (Cout, Cin, 1, 1), bias: (Cout,).

    compute_dtype applies to the streamed x slab and kron(I_TB, A) only;
    accumulation, the channel-matmul weight and the bias add stay f32.
    """
    N, Cin, T, V = x_nchw.shape
    Cout = weight.shape[0]
    out_dtype = x_nchw.dtype if out_dtype is None else out_dtype
    cdt = x_nchw.dtype if compute_dtype is None else compute_dtype

    # ---- tiling: cap L at one MXU pass, batch-block to fill the M dim ----
    l_cap = _mxu_depth()
    TB, Vp = _pick_t_tiling(T, V, l_cap)
    L = TB * Vp
    n_tb = T // TB
    NB = _pick_nb(N, Cin, Cout, n_tb)
    n_nb = N // NB
    Rin, Rout = NB * Cin, NB * Cout

    # ---- host-side glue (one-time / cheap) ----
    if Vp != V:
        x_use = jnp.pad(x_nchw, ((0, 0), (0, 0), (0, 0), (0, Vp - V)))
        A_use = jnp.pad(A, ((0, Vp - V), (0, Vp - V)))
    else:
        x_use, A_use = x_nchw, A

    x2d = x_use.reshape(N * Cin, T * Vp).astype(cdt)                       # streamed
    a_kron = jnp.kron(jnp.eye(TB, dtype=A_use.dtype), A_use).astype(cdt)   # (L, L) resident
    w_mat = weight.reshape(Cout, Cin).astype(jnp.float32)
    w_big = jnp.kron(jnp.eye(NB, dtype=jnp.float32), w_mat)                # (Rout, Rin) f32
    brow = jnp.tile(bias.astype(jnp.float32), NB).reshape(Rout, 1)         # rank-1 bias
    bcol = jnp.tile(jnp.sum(A_use, axis=0).astype(jnp.float32), TB).reshape(1, L)

    a_first = Cin <= Cout  # run the big A-contraction on the smaller-channel side

    out2d = pl.pallas_call(
        functools.partial(gcn_kernel, a_first=a_first),
        out_shape=jax.ShapeDtypeStruct((N * Cout, T * Vp), out_dtype),
        grid=(n_nb, n_tb),
        in_specs=[
            pl.BlockSpec((Rin, L), lambda nb, tb: (nb, tb)),       # x slab (streamed)
            pl.BlockSpec((Rout, Rin), lambda nb, tb: (0, 0)),      # kron(I_NB, W), resident
            pl.BlockSpec((Rout, 1), lambda nb, tb: (0, 0)),        # bias row factor
            pl.BlockSpec((1, L), lambda nb, tb: (0, 0)),           # bias col factor
            pl.BlockSpec((L, L), lambda nb, tb: (0, 0)),           # kron(I_TB, A), resident
        ],
        out_specs=pl.BlockSpec((Rout, L), lambda nb, tb: (nb, tb)),
        compiler_params=pltpu.CompilerParams(
            # Total VMEM (double-buffered blocks + resident operands) is ~1-3 MiB
            # with the L cap, under every generation's default scoped limit, so no
            # vmem_limit override / single-buffering / deeper input buffering needed.
            dimension_semantics=("parallel", "parallel"),
        ),
    )(x2d, w_big, brow, bcol, a_kron)

    y = out2d.reshape(N, Cout, T, Vp)                                      # free reshape
    if Vp != V:
        y = y[..., :V]
    return y, A


def reference_forward(x_nchw, A, weight, bias):
    # Plain-JAX reference of the PyTorch forward (1x1 conv + einsum).
    w = weight.reshape(weight.shape[0], weight.shape[1])
    h = jnp.einsum('oc,nctv->notv', w, x_nchw) + bias[None, :, None, None]
    return jnp.einsum('nctv,vw->nctw', h, A)


if __name__ == "__main__":
    key = jax.random.PRNGKey(0)

    def make_case(k, N, Cin, Cout, T, V):
        kx, ka, kw, kb = jax.random.split(k, 4)
        x = jax.random.normal(kx, (N, Cin, T, V), dtype=jnp.float32)
        A = jax.random.normal(ka, (V, V), dtype=jnp.float32)
        bound = 1.0 / np.sqrt(Cin)  # Conv2d(kernel=(1,1)) default init bound
        w = jax.random.uniform(kw, (Cout, Cin, 1, 1), jnp.float32, -bound, bound)
        b = jax.random.uniform(kb, (Cout,), jnp.float32, -bound, bound)
        return x, A, w, b

    keys = jax.random.split(key, 3)

    # 1) Main shape, strict f32 check.
    x, A, w, b = make_case(keys[0], 2, 4, 8, 16, 16)
    y, A_out = gcn_forward(x, A, w, b, compute_dtype=jnp.float32)
    jax.block_until_ready(y)
    y_ref = reference_forward(x, A, w, b)
    assert y.shape == (2, 8, 16, 16)
    assert np.allclose(np.asarray(y), np.asarray(y_ref), atol=1e-3, rtol=1e-3)
    assert np.array_equal(np.asarray(A_out), np.asarray(A))

    # 2) Same shape, default bf16 operands (f32 accumulation), loose tolerance.
    y_bf, _ = gcn_forward(x, A, w, b)
    jax.block_until_ready(y_bf)
    assert np.allclose(np.asarray(y_bf), np.asarray(y_ref), atol=2e-1, rtol=5e-2)

    # 3) Non-lane-friendly V (skeleton-like, V=25) exercises the V-padding path.
    x3, A3, w3, b3 = make_case(keys[1], 2, 4, 8, 12, 25)
    y3, _ = gcn_forward(x3, A3, w3, b3, compute_dtype=jnp.float32)
    jax.block_until_ready(y3)
    y3_ref = reference_forward(x3, A3, w3, b3)
    assert y3.shape == (2, 8, 12, 25)
    assert np.allclose(np.asarray(y3), np.asarray(y3_ref), atol=1e-3, rtol=1e-3)

    # 4) Cin > Cout exercises the conv-first contraction order.
    x4, A4, w4, b4 = make_case(keys[2], 2, 8, 4, 16, 16)
    y4, _ = gcn_forward(x4, A4, w4, b4, compute_dtype=jnp.float32)
    jax.block_until_ready(y4)
    y4_ref = reference_forward(x4, A4, w4, b4)
    assert np.allclose(np.asarray(y4), np.asarray(y4_ref), atol=1e-3, rtol=1e-3)

    print("KERNEL_OK")
</pallas_src>

<mosaic_0001>
module attributes {stable_mosaic.version = 11 : i64} {
  func.func @gcn_kernel(%arg0: i32, %arg1: i32, %arg2: memref<8x128xf32, #tpu.memory_space<vmem>>, %arg3: memref<16x8xf32, #tpu.memory_space<vmem>>, %arg4: memref<16x1xf32, #tpu.memory_space<vmem>>, %arg5: memref<1x128xf32, #tpu.memory_space<vmem>>, %arg6: memref<128x128xf32, #tpu.memory_space<vmem>>, %arg7: memref<16x128xf32, #tpu.memory_space<vmem>>) attributes {dimension_semantics = [#tpu.dimension_semantics<parallel>, #tpu.dimension_semantics<parallel>], iteration_bounds = array<i64: 1, 2>, scalar_prefetch = 0 : i64, scratch_operands = 0 : i64, tpu.core_type = #tpu.core_type<tc>, window_params = [{transform_indices = @transform_0, window_bounds = array<i64: 8, 128>}, {pipeline_mode = #tpu.pipeline_mode<synchronous>, transform_indices = @transform_1, window_bounds = array<i64: 16, 8>}, {pipeline_mode = #tpu.pipeline_mode<synchronous>, transform_indices = @transform_2, window_bounds = array<i64: 16, 1>}, {pipeline_mode = #tpu.pipeline_mode<synchronous>, transform_indices = @transform_3, window_bounds = array<i64: 1, 128>}, {pipeline_mode = #tpu.pipeline_mode<synchronous>, transform_indices = @transform_4, window_bounds = array<i64: 128, 128>}, {transform_indices = @transform_5, window_bounds = array<i64: 16, 128>}]} {
    %c0 = arith.constant 0 : index
    %c0_0 = arith.constant 0 : index
    %0 = vector.load %arg2[%c0, %c0_0] : memref<8x128xf32, #tpu.memory_space<vmem>>, vector<8x128xf32>
    %c0_1 = arith.constant 0 : index
    %c0_2 = arith.constant 0 : index
    %1 = vector.load %arg3[%c0_1, %c0_2] : memref<16x8xf32, #tpu.memory_space<vmem>>, vector<16x8xf32>
    %c0_3 = arith.constant 0 : index
    %c0_4 = arith.constant 0 : index
    %2 = vector.load %arg6[%c0_3, %c0_4] : memref<128x128xf32, #tpu.memory_space<vmem>>, vector<128x128xf32>
    %cst = arith.constant dense<0.000000e+00> : vector<8x128xf32>
    %3 = tpu.matmul %0, %2, %cst {dimension_numbers = #tpu.dot_dimension_numbers<[1], [0], [0], [1], [0, 0, 1, 1], [], []>} : vector<8x128xf32>, vector<128x128xf32>, vector<8x128xf32> -> vector<8x128xf32>
    %cst_5 = arith.constant dense<0.000000e+00> : vector<16x128xf32>
    %4 = tpu.matmul %1, %3, %cst_5 {dimension_numbers = #tpu.dot_dimension_numbers<[1], [0], [0], [1], [0, 0, 1, 1], [], []>} : vector<16x8xf32>, vector<8x128xf32>, vector<16x128xf32> -> vector<16x128xf32>
    %c0_6 = arith.constant 0 : index
    %c0_7 = arith.constant 0 : index
    %5 = vector.load %arg4[%c0_6, %c0_7] : memref<16x1xf32, #tpu.memory_space<vmem>>, vector<16x1xf32>
    %c0_8 = arith.constant 0 : index
    %c0_9 = arith.constant 0 : index
    %6 = vector.load %arg5[%c0_8, %c0_9] : memref<1x128xf32, #tpu.memory_space<vmem>>, vector<1x128xf32>
    %7 = vector.broadcast %5 : vector<16x1xf32> to vector<16x128xf32>
    %8 = vector.broadcast %6 : vector<1x128xf32> to vector<16x128xf32>
    %9 = arith.mulf %7, %8 : vector<16x128xf32>
    %10 = arith.addf %4, %9 : vector<16x128xf32>
    %c0_10 = arith.constant 0 : index
    %c0_11 = arith.constant 0 : index
    %11 = vector.load %arg7[%c0_10, %c0_11] : memref<16x128xf32, #tpu.memory_space<vmem>>, vector<16x128xf32>
    tpu.vector_store %arg7[%c0_10, %c0_11], %10 {strides = array<i32>} : memref<16x128xf32, #tpu.memory_space<vmem>>, vector<16x128xf32>,
    return
  }
  func.func @transform_0(%arg0: i32, %arg1: i32) -> (i32, i32) {
    %c0_i32 = arith.constant 0 : i32
    return %arg0, %arg1 : i32, i32
  }
  func.func @transform_1(%arg0: i32, %arg1: i32) -> (i32, i32) {
    %c0_i32 = arith.constant 0 : i32
    %c0_i32_0 = arith.constant 0 : i32
    %c0_i32_1 = arith.constant 0 : i32
    return %c0_i32, %c0_i32_0 : i32, i32
  }
  func.func @transform_2(%arg0: i32, %arg1: i32) -> (i32, i32) {
    %c0_i32 = arith.constant 0 : i32
    %c0_i32_0 = arith.constant 0 : i32
    %c0_i32_1 = arith.constant 0 : i32
    return %c0_i32, %c0_i32_0 : i32, i32
  }
  func.func @transform_3(%arg0: i32, %arg1: i32) -> (i32, i32) {
    %c0_i32 = arith.constant 0 : i32
    %c0_i32_0 = arith.constant 0 : i32
    %c0_i32_1 = arith.constant 0 : i32
    return %c0_i32, %c0_i32_0 : i32, i32
  }
  func.func @transform_4(%arg0: i32, %arg1: i32) -> (i32, i32) {
    %c0_i32 = arith.constant 0 : i32
    %c0_i32_0 = arith.constant 0 : i32
    %c0_i32_1 = arith.constant 0 : i32
    return %c0_i32, %c0_i32_0 : i32, i32
  }
  func.func @transform_5(%arg0: i32, %arg1: i32) -> (i32, i32) {
    %c0_i32 = arith.constant 0 : i32
    return %arg0, %arg1 : i32, i32
  }
}

</mosaic_0001>

<bundles_post_ra>
// kernel: tpu_custom_call.1
= control target key start
LH: loop header
LB: loop body
LE: loop exit
PB: predicated region body
PF: predicated region fallthrough
CT: control target
= control target key end

     0   :  { %10 = vsyncpa [#allocation3], 0  ;;  %s1061_s0 = inlined_call_operand.vmem [shape: f32[8,256], index: 0, kind: input, shape index: {}]   ;;  %s1062_s1 = inlined_call_operand.vmem [shape: f32[16,8], index: 1, kind: input, shape index: {}]   ;;  %s1063_s2 = inlined_call_operand.vmem [shape: f32[16,1], index: 2, kind: input, shape index: {}]   ;;  %s1064_s3 = inlined_call_operand.vmem [shape: f32[1,128], index: 3, kind: input, shape index: {}]   ;;  %s1065_s4 = inlined_call_operand.hbm [shape: f32[128,128], index: 4, kind: input, shape index: {}]   ;;  %s1066_s5 = inlined_call_operand.hbm [shape: f32[16,256], index: 5, kind: output, shape index: {}]  }
   0x1   :  { %11 = vsyncpa [#allocation4], 0 }
   0x2   :  { %13 = vsyncpa [#allocation4 + $0x1], 0  ;;  %s893_s18 = smov 0   ;;  %s895_s19 = smov 0  }
   0x3   :  { %s897_s20 = smov 0   ;;  %s899_s21 = smov 0  }
   0x4   :  { %s901_s22 = smov 0   ;;  %s903_s23 = smov 0  }
   0x5 LB: > { %s564_s24 = sadd.s32 4294967295, %s850_s23   ;;  %s565_s25 = sadd.s32 4294967294, %s850_s23   ;;  %s850_s23 = sphi %s903_s23, %s19_s23   ;;  %s846_s22 = sphi %s901_s22, %s1084_s22   ;;  %s842_s21 = sphi %s899_s21, %s1083_s21   ;;  %s838_s20 = sphi %s897_s20, %s1082_s20   ;;  %s834_s19 = sphi %s895_s19, %s1081_s19   ;;  %s830_s18 = sphi %s893_s18, %s1080_s18  }
   0x6   : > { %s28_s26 = sadd.s32 1, %s846_s22  ;;  %s152_s27 = sadd.s32 1, %s838_s20 }
   0x7   : > { %p29_p0 = scmp.ge.s32.totalorder %s28_s26, 2  ;;  %p162_p1 = scmp.ne.s32.totalorder %s838_s20, %s834_s19 }
   0x8   : > { %p163_p2 = scmp.eq.s32.totalorder %s564_s24, 1  ;;  %p168_p3 = scmp.ne.s32.totalorder %s834_s19, %s830_s18 }
   0x9   : > { %s1086_s26 = smov (%p29_p0, %s28_s26), 0  ;;  %p169_p5 = scmp.eq.s32.totalorder %s565_s25, 1 }
   0xa   : > { %p933_p4 = por %p163_p2, %p162_p1  ;;  %s148_s29 = ssub.s32 %s846_s22, %s1086_s26 }
   0xb   : > { %p566_p6 = scmp.ge.s32.totalorder %s850_s23, 1  ;;  %p150_p7 = scmp.eq.s32.totalorder %s148_s29, 0 }
   0xc   : > { %s1071_s28 = scalar_select %p933_p4, 1, 0 }
   0xd   : > { %p940_p8 = por %p169_p5, %p168_p3  ;;  %p176_p9 = scmp.lt.s32.totalorder %s850_s23, 3 }
   0xe   : > { %s946_s6 = scalar_select %p150_p7, %s838_s20, %s152_s27  }
   0xf   : > { %s1072_s30 = scalar_select %p940_p8, 1, 0 }
  0x10   : > { %p948_p10 = pnand %p566_p6, %p176_p9  ;;  %p952_p11 = scmp.eq.s32.totalorder %s564_s24, 0 }
  0x11   : > { %s852_s9 = smov [#allocation2]   ;;  %s740_s14 = scalar_lea.hbm %s1065_s4, 2048 }
  0x12   : > { %s1073_s7 = scalar_select %p948_p10, 1, 0 }
  0x13   : > { %s1074_s8 = scalar_select %p952_p11, 1, 0 }
  0x14   : > { %p670_p12 = pneg %p948_p10  ;;  %s197_s10 = sshll.u32 %s852_s9, 4  ;;  %s198_s10 = int_to_ptr.vmem [resolvable:$true] %s197_s10 }
  0x15   : > { %p741_p0 = scmp.ne.s32.totalorder %s1065_s4, %s740_s14  ;;  %p747_p5 = scmp.lt.u32.totalorder %s740_s14, %s1065_s4 }
  0x16   : > { %p960_p13 = pnand %p952_p11, %p670_p12 }
  0x18   : > { %p742_p1 = pneg %p960_p13 }
  0x1a   : > { %p743_p2 = pnand %p742_p1, %p741_p0 }
  0x1c   : > { %p744_p3 = pneg %p743_p2 }
  0x1e   : > { %p749_p6 = pnand %p747_p5, %p744_p3 }
  0x20   : > { %752 = shalt.err (!%p749_p6)
}
  0x21   : > { %s753_s25 = scalar_lea.vmem %s198_s10, 2048  ;;  %p761_p8 = scmp.lt.s32.totalorder %s198_s10, %s198_s10 }
  0x22   : > { %p754_p7 = scmp.ne.s32.totalorder %s198_s10, %s753_s25  ;;  %p762_p4 = scmp.lt.s32.totalorder %s753_s25, %s753_s25 }
  0x24   : > { %p756_p9 = pnand %p754_p7, %p742_p1  ;;  %p763_p11 = por %p762_p4, %p761_p8 }
  0x26   : > { %p757_p12 = pneg %p756_p9 }
  0x28   : > { %p764_p10 = pnand %p763_p11, %p757_p12 }
  0x2a   : > { %767 = shalt.err (!%p764_p10)
}
  0x2b   : > { %s853_s27 = smov 128   ;;  %s854_s29 = smov 8  }
  0x2c   : > { %673 = dma.hbm_to_vmem [thread:$0]  (!%p960_p13), %s1065_s4, 2048, %s198_s10, [#allocation3], %s853_s27, %s853_s27, %s854_s29  }
  0x2d   : > { %p1076_p0 = scmp.ne.s32.totalorder %s1073_s7, 0 }
  0x2e   : > { %p1077_p2 = scmp.ne.s32.totalorder (!%p1076_p0), %s1074_s8, 0 }
  0x2f   : > { %224 = sbr.rel (%p1076_p0) target bundleno = 535 (0x217), region = 40 }
  0x36   : > { %821 = dma.done.wait (%p1077_p2), [#allocation3], 2048  }
  0x37   : > { %823 = vsyncadd (%p1077_p2), [#allocation3], 4294965248  ;;  %v855_v0 = vmov 0.0|0.0   ;;  %vm856_vm0 = vmmov 0   ;;  %v857_v1 = vmov 0.0   ;;  %v267_v2 = vld [vmem:[#allocation2] sm:$0xff] }
  0x38   : > { %640 = vmatprep.subr.bf16.mxu0 %v855_v0  ;;  %632 = vmatprep.mubr.msk.f32.mxu0 %vm856_vm0, %v857_v1  ;;  %v268_v3 = vld [vmem:[#allocation2 + $0x8] sm:$0xff]  ;;  %v269_v4 = vld [vmem:[#allocation2 + $0x10] sm:$0xff]  ;;  %v270_v6 = vld [vmem:[#allocation2 + $0x18] sm:$0xff]  ;;  %p257_p4 = scmp.lt.s32.totalorder %s842_s21, 1  ;;  %vm374_vm1 = vcmask 64512   ;;  %v858_v29 = vmov 0  }
  0x39   : > { %v641_v5 = vpack.c.bf16 %v268_v3, %v267_v2  ;;  %v644_v7 = vpack.c.bf16 %v270_v6, %v269_v4  ;;  %v271_v8 = vld [vmem:[#allocation2 + $0x20] sm:$0xff]  ;;  %v272_v9 = vld [vmem:[#allocation2 + $0x28] sm:$0xff]  ;;  %v273_v11 = vld [vmem:[#allocation2 + $0x30] sm:$0xff]  ;;  %739 = vset.pattern.permute.xlu0 %v858_v29  ;;  %s252_s9 = sand.u32 1, %s834_s19   ;;  %p1078_p10 = scmp.ne.s32.totalorder %s1071_s28, 0 }
  0x3a   : > { %v647_v10 = vpack.c.bf16 %v272_v9, %v271_v8  ;;  %v274_v12 = vld [vmem:[#allocation2 + $0x38] sm:$0xff]  ;;  %v275_v14 = vld [vmem:[#allocation2 + $0x40] sm:$0xff]  ;;  %v276_v15 = vld [vmem:[#allocation2 + $0x48] sm:$0xff]  ;;  %s258_s7 = scalar_select %p257_p4, %s842_s21, 1 }
  0x3b   : > { %642 = vmatpush3.bf16.msra.mxu0 %v641_v5  ;;  %v650_v13 = vpack.c.bf16 %v274_v12, %v273_v11  ;;  %v653_v16 = vpack.c.bf16 %v276_v15, %v275_v14  ;;  %v277_v17 = vld [vmem:[#allocation2 + $0x50] sm:$0xff]  ;;  %v278_v18 = vld [vmem:[#allocation2 + $0x58] sm:$0xff]  ;;  %v279_v20 = vld [vmem:[#allocation2 + $0x60] sm:$0xff]  ;;  %s571_s12 = sshll.u32 %s252_s9, 4  ;;  %s1015_s17 = scalar_lea.sflag [#allocation4], %s252_s9 }
  0x3c   : > { %643 = vmatprep.subr.bf16.mxu0 %v855_v0  ;;  %v656_v19 = vpack.c.bf16 %v278_v18, %v277_v17  ;;  %v280_v21 = vld [vmem:[#allocation2 + $0x68] sm:$0xff]  ;;  %v281_v23 = vld [vmem:[#allocation2 + $0x70] sm:$0xff]  ;;  %v282_v24 = vld [vmem:[#allocation2 + $0x78] sm:$0xff]  ;;  %s572_s8 = sshll.u32 %s258_s7, 3  ;;  %s254_s10 = scalar_lea.vmem [#allocation5], %s571_s12 }
  0x3d   : > { %v659_v22 = vpack.c.bf16 %v280_v21, %v279_v20  ;;  %v662_v25 = vpack.c.bf16 %v282_v24, %v281_v23  ;;  %s262_s13 = scalar_lea.vmem %s1061_s0, %s572_s8  ;;  %v265_v27 = vld [vmem:[%s1062_s1] sm:$0xff]  ;;  %v354_v30 = vld [vmem:[%s1063_s2 + $0x8] sm:$0xff]  ;;  %s474_s11 = sshll.u32 %s254_s10, 4  ;;  %s1008_s11 = int_to_ptr.vmem [resolvable:$true] %s474_s11 }
  0x3e   : > { %v264_v26 = vld [vmem:[%s262_s13] sm:$0xff]  ;;  %637 = vmatprep.mubr.msk.f32.mxu1 %vm374_vm1, %v265_v27  ;;  %v266_v32 = vld [vmem:[%s1062_s1 + $0x8] sm:$0xff]  ;;  %s577_s13 = sshll.u32 %s842_s21, 7  ;;  %s768_s21 = scalar_lea.vmem %s1008_s11, 256 }
  0x3f   : > { %645 = vmatpush3.bf16.msra.mxu0 %v644_v7  ;;  %v353_v28 = vld [vmem:[%s1063_s2] sm:$0xff]  ;;  %s1013_s16 = scalar_lea.hbm %s1066_s5, %s577_s13  ;;  %p769_p8 = scmp.ne.s32.totalorder %s1008_s11, %s768_s21 }
  0x40   : > { %646 = vmatprep.subr.bf16.mxu0 %v855_v0  ;;  %358 = vperm.xlu0 %739, %v353_v28   ;;  %v573_v35 = vld [vmem:[%s1064_s3] ss:$0 sm:$0xff]  ;;  %s859_s24 = smov [#allocation5]  }
  0x41   : > { %p770_p11 = pnand %p769_p8, %p1078_p10  ;;  %s772_s25 = sshll.u32 %s859_s24, 4  ;;  %s773_s25 = int_to_ptr.vmem [resolvable:$false] %s772_s25 }
  0x42   : > { %s774_s27 = scalar_lea.vmem %s773_s25, 512  ;;  %p775_p1 = scmp.lt.s32.totalorder %s1008_s11, %s773_s25 }
  0x43   : > { %648 = vmatpush3.bf16.msra.mxu0 %v647_v10  ;;  %p771_p13 = pneg %p770_p11  ;;  %p776_p3 = scmp.lt.s32.totalorder %s774_s27, %s768_s21 }
  0x44   : > { %649 = vmatprep.subr.bf16.mxu0 %v855_v0  ;;  %363 = vperm.xlu0 %739, %v354_v30  }
  0x45   : > { %p777_p5 = por %p776_p3, %p775_p1 }
  0x47   : > { %651 = vmatpush3.bf16.msra.mxu0 %v650_v13  ;;  %p778_p6 = pnand %p777_p5, %p771_p13 }
  0x48   : > { %652 = vmatprep.subr.bf16.mxu0 %v855_v0 }
  0x4b   : > { %654 = vmatpush3.bf16.msra.mxu0 %v653_v16 }
  0x4c   : > { %655 = vmatprep.subr.bf16.mxu0 %v855_v0 }
  0x4f   : > { %657 = vmatpush3.bf16.msra.mxu0 %v656_v19 }
  0x50   : > { %658 = vmatprep.subr.bf16.mxu0 %v855_v0 }
  0x53   : > { %660 = vmatpush3.bf16.msra.mxu0 %v659_v22 }
  0x54   : > { %661 = vmatprep.subr.bf16.mxu0 %v855_v0 }
  0x57   : > { %663 = vmatpush3.bf16.msra.mxu0 %v662_v25 }
  0x5a   : > { %633 = vmatmul.mubr.f32.vlgmr.msra.gmra.mrb[0].mxu0 %v264_v26 }
  0xbf   : > { %v359_v34 = vpop.permute.xlu0 %358 }
  0xc0   : > { %v372_v38 = vmul.f32 %v573_v35, %v359_v34 }
  0xc3   : > { %v364_v36 = vpop.permute.xlu0 %363 }
  0xc4   : > { %v373_v37 = vmul.f32 %v573_v35, %v364_v36 }
 0x12d   : > { %v349_v31 = vpop.f32.mrb[0].mxu0 }
 0x12e   : > { %v634_v33 = vpop.f32.mrb[1].mxu0  ;;  %635 = vmatprep.subr.mxu1 %v349_v31 }
 0x12f   : > { %636 = vmatpush3.msra.mxu1 %v349_v31 }
 0x130   : > { %638 = vmatmul.mubr.msk.f32.vlgmr.msra.gmra.mrb[0].mxu1 %vm374_vm1, %v266_v32 }
 0x203   : > { %v639_v39 = vpop.f32.mrb[0].mxu1 }
 0x204   : > { %v453_v40 = vadd.f32 %v639_v39, %v373_v37  ;;  %v447_v41 = vpop.f32.mrb[1].mxu1 }
 0x205   : > { %v448_v42 = vadd.f32 %v447_v41, %v372_v38 }
 0x206   : > { %457 = vst [vmem:[%s254_s10 + $0x8] sm:$0xff] %v453_v40 }
 0x207   : > { %456 = vst [vmem:[%s254_s10] sm:$0xff] %v448_v42 }
 0x208   : > { %781 = shalt.err (!%p778_p6)
}
 0x209   : > { %s782_s29 = scalar_lea.hbm %s1013_s16, 256  ;;  %s786_s7 = scalar_lea.hbm %s1066_s5, 512 }
 0x20a   : > { %p783_p7 = scmp.ne.s32.totalorder %s1013_s16, %s782_s29  ;;  %p787_p0 = scmp.lt.u32.totalorder %s1013_s16, %s1066_s5 }
 0x20b   : > { %p788_p2 = scmp.lt.u32.totalorder %s786_s7, %s782_s29  ;;  %p790_p8 = scmp.lt.u32.totalorder %s782_s29, %s1013_s16 }
 0x20c   : > { %p784_p9 = pnand %p783_p7, %p1078_p10 }
 0x20d   : > { %p789_p4 = por %p788_p2, %p787_p0 }
 0x20e   : > { %p785_p12 = pneg %p784_p9 }
 0x20f   : > { %p791_p11 = por %p790_p8, %p789_p4 }
 0x211   : > { %p792_p13 = pnand %p791_p11, %p785_p12 }
 0x213   : > { %795 = shalt.err (!%p792_p13)
}
 0x214   : > { %s860_s13 = smov 128   ;;  %s861_s14 = smov 256  }
 0x215   : > { %s862_s15 = smov 8  }
 0x216   : > { %668 = dma.vmem_to_hbm [thread:$0]  (%p1078_p10), %s1008_s11, 256, %s1013_s16, %s1015_s17, %s860_s13, %s861_s14, %s862_s15  }
 0x217 PF: > { %p680_p1 = scmp.ge.s32.totalorder %s850_s23, 2  ;;  %s489_s21 = sand.u32 1, %s830_s18  }
 0x218   : > { %p1079_p3 = scmp.ne.s32.totalorder %s1072_s30, 0  ;;  %s490_s24 = scalar_lea.sflag [#allocation4], %s489_s21 }
 0x21a   : > { %p675_p5 = pnand %p680_p1, %p1079_p3 }
 0x21c   : > { %825 = dma.done.wait (!%p675_p5), %s490_s24, 256  }
 0x21d   : > { %827 = vsyncadd (!%p675_p5), %s490_s24, 4294967040  ;;  %s19_s23 = sadd.s32 1, %s850_s23   ;;  %s1080_s18 = smov %s834_s19 }
 0x21e   : > { %p16_p6 = scmp.ge.s32.totalorder %s19_s23, 4   ;;  %s1081_s19 = smov %s838_s20 }
 0x21f   : > { %s1082_s20 = smov %s946_s6  ;;  %s1083_s21 = smov %s846_s22 }
 0x220   : > { %s1084_s22 = smov %s1086_s26  ;;  %18 = sbr.rel (!%p16_p6) target bundleno = 5 (0x5), region = 80 }
 0x227   :  { %495 = vsyncpa [#allocation3], 1 }
 0x228   :  { %497 = vsyncpa [#allocation3 + $0x1], 1 }
 0x229   :  { %498 = vsyncpa [#allocation4], 1 }
 0x22a   :  { %500 = vsyncpa [#allocation4 + $0x1], 1 }

</bundles_post_ra>
